<compile_context>
chip_gen: v6e
topology: v6e:2x2x1
jax: 0.10.0
libtpu: 0.0.40
codegen_flags: <defaults>
</compile_context>

<pallas_src>
import jax
import jax.numpy as jnp
from jax.experimental import pallas as pl
from jax.experimental.pallas import tpu as pltpu

OUT_CH = 96          # output channels of the module
KH = KW = 5
K_TAPS = KH * KW     # 25
K_PAD = 32           # contraction padded 25 -> 32 (zero rows, bf16-friendly)

# Spatial (lane-axis) tiling: a single full-extent block when small, else
# 1024-lane tiles (multiple of 128 -> lane-dense stores).
_FULL_BLOCK_MAX = 2048
_T_SP_LARGE = 1024


def _conv_cm_kernel(p_ref, w_ref, b_ref, o_ref):
    # p_ref: (1, 32, T_SP) bf16  — transposed patches (taps x spatial)
    # w_ref: (96, 32)      bf16  — channel-major weights (resident)
    # b_ref: (96, 1)       f32   — bias column (resident)
    # o_ref: (1, 96, T_SP) f32   — channel-major NCHW output tile
    acc = jnp.dot(w_ref[...], p_ref[0], preferred_element_type=jnp.float32)
    acc = acc + b_ref[...]                       # (96,1) broadcast over lanes
    o_ref[0] = jnp.maximum(acc, 0.0).astype(o_ref.dtype)


@jax.jit
def client_model1_forward(x, weight, bias):
    """x: (N, 1, H, W) f32, weight: (96, 1, 5, 5) f32, bias: (96,) f32.

    Returns relu(conv2d(x, weight, bias)) with shape (N, 96, H-4, W-4), NCHW.
    Patches/weights are streamed in bf16 with f32 accumulation.
    """
    n, c, h, w = x.shape
    assert c == 1
    oh, ow = h - KH + 1, w - KW + 1
    ohw = oh * ow

    # ---- transposed im2col (taps-major), bf16. Candidate for input fusion. ----
    img = x[:, 0].astype(jnp.bfloat16)                               # (N, H, W)
    taps = [img[:, i:i + oh, j:j + ow].reshape(n, 1, ohw)
            for i in range(KH) for j in range(KW)]                   # 25 x (N,1,OHW)
    p_t = jnp.concatenate(taps, axis=1)                              # (N, 25, OHW)
    p_t = jnp.pad(p_t, ((0, 0), (0, K_PAD - K_TAPS), (0, 0)))        # (N, 32, OHW)

    # ---- channel-major weights / bias ----
    w_cm = jnp.pad(weight.reshape(OUT_CH, K_TAPS),
                   ((0, 0), (0, K_PAD - K_TAPS))).astype(jnp.bfloat16)   # (96, 32)
    b_col = bias.reshape(OUT_CH, 1).astype(jnp.float32)                  # (96, 1)

    # ---- spatial tiling ----
    if ohw <= _FULL_BLOCK_MAX:
        t_sp = ohw                 # single full-extent block: no padding at all
    else:
        t_sp = _T_SP_LARGE         # lane-dense tiles; final block may be partial
    n_sp = pl.cdiv(ohw, t_sp)
    grid = (n, n_sp)               # >= 2 steps (batch axis), both parallel

    cost = pl.CostEstimate(
        flops=2 * n * n_sp * t_sp * K_PAD * OUT_CH,
        transcendentals=0,
        bytes_accessed=(n * K_PAD * ohw * 2          # bf16 patch stream
                        + OUT_CH * K_PAD * 2         # bf16 weights
                        + OUT_CH * 4                 # bias
                        + n * OUT_CH * ohw * 4),     # f32 output stream
    )

    out_flat = pl.pallas_call(
        _conv_cm_kernel,
        out_shape=jax.ShapeDtypeStruct((n, OUT_CH, ohw), jnp.float32),
        grid=grid,
        in_specs=[
            pl.BlockSpec((1, K_PAD, t_sp), lambda b, t: (b, 0, t)),   # patches^T
            pl.BlockSpec((OUT_CH, K_PAD), lambda b, t: (0, 0)),       # resident W
            pl.BlockSpec((OUT_CH, 1), lambda b, t: (0, 0)),           # resident b
        ],
        out_specs=pl.BlockSpec((1, OUT_CH, t_sp), lambda b, t: (b, 0, t)),
        compiler_params=pltpu.CompilerParams(
            dimension_semantics=("parallel", "parallel"),
            allow_input_fusion=[True, False, False],
        ),
        cost_estimate=cost,
    )(p_t, w_cm, b_col)

    # Free metadata reshape only — no slice, no transpose, no channel unpad.
    return out_flat.reshape(n, OUT_CH, oh, ow)


def _reference(x, weight, bias):
    # Pure-JAX reference conv (NCHW, OIHW) + relu for correctness check.
    y = jax.lax.conv_general_dilated(
        x, weight, window_strides=(1, 1), padding="VALID",
        dimension_numbers=("NCHW", "OIHW", "NCHW"))
    return jnp.maximum(y + bias.reshape(1, OUT_CH, 1, 1), 0.0)


if __name__ == "__main__":
    key = jax.random.PRNGKey(0)
    kx, kw_, kb = jax.random.split(key, 3)

    # Small shapes consistent with the module: batch=2, 1 channel, 16x16 image.
    x = jax.random.normal(kx, (2, 1, 16, 16), dtype=jnp.float32)

    # Deterministic synthetic parameters (same shapes as nn.Conv2d(1, 96, 5)).
    fan_in = 1 * KH * KW
    bound = 1.0 / jnp.sqrt(fan_in)
    weight = jax.random.uniform(kw_, (OUT_CH, 1, KH, KW),
                                minval=-bound, maxval=bound, dtype=jnp.float32)
    bias = jax.random.uniform(kb, (OUT_CH,),
                              minval=-bound, maxval=bound, dtype=jnp.float32)

    out = jax.block_until_ready(client_model1_forward(x, weight, bias))
    assert out.shape == (2, OUT_CH, 12, 12), out.shape

    # Tight check against a reference with identically bf16-quantized operands
    # (kernel accumulates in f32), plus a looser check against the pure-f32
    # reference to bound the bf16 streaming error.
    ref_bf16 = _reference(x.astype(jnp.bfloat16).astype(jnp.float32),
                          weight.astype(jnp.bfloat16).astype(jnp.float32), bias)
    ref_f32 = _reference(x, weight, bias)
    assert jnp.allclose(out, ref_bf16, atol=1e-4, rtol=1e-3), \
        "mismatch vs bf16-quantized reference"
    assert jnp.allclose(out, ref_f32, atol=5e-2, rtol=5e-2), \
        "mismatch vs f32 reference"

    print("KERNEL_OK")
</pallas_src>

<mosaic_0001>
module attributes {stable_mosaic.version = 11 : i64} {
  func.func @_conv_cm_kernel(%arg0: i32, %arg1: i32, %arg2: memref<1x32x144xbf16, #tpu.memory_space<vmem>>, %arg3: memref<96x32xbf16, #tpu.memory_space<vmem>>, %arg4: memref<96x1xf32, #tpu.memory_space<vmem>>, %arg5: memref<1x96x144xf32, #tpu.memory_space<vmem>>) attributes {dimension_semantics = [#tpu.dimension_semantics<parallel>, #tpu.dimension_semantics<parallel>], iteration_bounds = array<i64: 2, 1>, scalar_prefetch = 0 : i64, scratch_operands = 0 : i64, tpu.core_type = #tpu.core_type<tc>, window_params = [{transform_indices = @transform_0, window_bounds = array<i64: 1, 32, 144>}, {pipeline_mode = #tpu.pipeline_mode<synchronous>, transform_indices = @transform_1, window_bounds = array<i64: 96, 32>}, {pipeline_mode = #tpu.pipeline_mode<synchronous>, transform_indices = @transform_2, window_bounds = array<i64: 96, 1>}, {transform_indices = @transform_3, window_bounds = array<i64: 1, 96, 144>}]} {
    %c0 = arith.constant 0 : index
    %c0_0 = arith.constant 0 : index
    %0 = vector.load %arg3[%c0, %c0_0] : memref<96x32xbf16, #tpu.memory_space<vmem>>, vector<96x32xbf16>
    %c0_1 = arith.constant 0 : index
    %c0_2 = arith.constant 0 : index
    %c0_3 = arith.constant 0 : index
    %1 = vector.load %arg2[%c0_1, %c0_2, %c0_3] : memref<1x32x144xbf16, #tpu.memory_space<vmem>>, vector<1x32x144xbf16>
    %2 = vector.shape_cast %1 : vector<1x32x144xbf16> to vector<32x144xbf16>
    %cst = arith.constant dense<0.000000e+00> : vector<96x144xf32>
    %3 = tpu.matmul %0, %2, %cst {dimension_numbers = #tpu.dot_dimension_numbers<[1], [0], [0], [1], [0, 0, 1, 1], [], []>} : vector<96x32xbf16>, vector<32x144xbf16>, vector<96x144xf32> -> vector<96x144xf32>
    %c0_4 = arith.constant 0 : index
    %c0_5 = arith.constant 0 : index
    %4 = vector.load %arg4[%c0_4, %c0_5] : memref<96x1xf32, #tpu.memory_space<vmem>>, vector<96x1xf32>
    %5 = vector.broadcast %4 : vector<96x1xf32> to vector<96x144xf32>
    %6 = arith.addf %3, %5 : vector<96x144xf32>
    %cst_6 = arith.constant 0.000000e+00 : f32
    %7 = vector.broadcast %cst_6 : f32 to vector<96x144xf32>
    %8 = arith.maximumf %6, %7 : vector<96x144xf32>
    %c0_7 = arith.constant 0 : index
    %c0_8 = arith.constant 0 : index
    %c0_9 = arith.constant 0 : index
    %9 = vector.load %arg5[%c0_7, %c0_8, %c0_9] : memref<1x96x144xf32, #tpu.memory_space<vmem>>, vector<1x96x144xf32>
    %10 = vector.shape_cast %9 : vector<1x96x144xf32> to vector<96x144xf32>
    %11 = vector.shape_cast %8 : vector<96x144xf32> to vector<1x96x144xf32>
    tpu.vector_store %arg5[%c0_7, %c0_8, %c0_9], %11 {strides = array<i32>} : memref<1x96x144xf32, #tpu.memory_space<vmem>>, vector<1x96x144xf32>,
    return
  }
  func.func @transform_0(%arg0: i32, %arg1: i32) -> (i32, i32, i32) {
    %c0_i32 = arith.constant 0 : i32
    %c0_i32_0 = arith.constant 0 : i32
    return %arg0, %c0_i32, %arg1 : i32, i32, i32
  }
  func.func @transform_1(%arg0: i32, %arg1: i32) -> (i32, i32) {
    %c0_i32 = arith.constant 0 : i32
    %c0_i32_0 = arith.constant 0 : i32
    %c0_i32_1 = arith.constant 0 : i32
    return %c0_i32, %c0_i32_0 : i32, i32
  }
  func.func @transform_2(%arg0: i32, %arg1: i32) -> (i32, i32) {
    %c0_i32 = arith.constant 0 : i32
    %c0_i32_0 = arith.constant 0 : i32
    %c0_i32_1 = arith.constant 0 : i32
    return %c0_i32, %c0_i32_0 : i32, i32
  }
  func.func @transform_3(%arg0: i32, %arg1: i32) -> (i32, i32, i32) {
    %c0_i32 = arith.constant 0 : i32
    %c0_i32_0 = arith.constant 0 : i32
    return %arg0, %c0_i32, %arg1 : i32, i32, i32
  }
}

</mosaic_0001>

<bundles_post_ra>
// kernel: client_model1_forward.2
= control target key start
LH: loop header
LB: loop body
LE: loop exit
PB: predicated region body
PF: predicated region fallthrough
CT: control target
= control target key end

     0   :  { %s926_s17 = smov 0   ;;  %s928_s18 = smov 0   ;;  %s1093_s0 = inlined_call_operand.vmem [shape: bf16[96,32], index: 0, kind: input, shape index: {}]   ;;  %s1094_s1 = inlined_call_operand.vmem [shape: f32[96,1], index: 1, kind: input, shape index: {}]   ;;  %s1095_s2 = inlined_call_operand.vmem [shape: bf16[2,25,144], index: 2, kind: input, shape index: {}]   ;;  %s1096_s3 = inlined_call_operand.<no memory space> [shape: bf16[], index: 3, kind: input, shape index: {}]   ;;  %s1097_s4 = inlined_call_operand.vmem [shape: f32[2,96,144], index: 4, kind: output, shape index: {}]  }
   0x1   :  { %v9_v0 = vstv %s1096_s3  ;;  %s930_s19 = smov 0  }
   0x2   :  { %v924_v1 = vunpack.i.l.bf16 %v9_v0 }
   0x3 LB: > { %s31_s3 = sadd.s32 1, %s888_s18  ;;  %p795_p0 = scmp.ge.s32.totalorder %s892_s19, 1  ;;  %s892_s19 = sphi %s930_s19, %s19_s19   ;;  %s888_s18 = sphi %s928_s18, %s1099_s18   ;;  %s884_s17 = sphi %s926_s17, %s1098_s17  }
   0x4   : > { %p33_p1 = scmp.ge.s32.totalorder %s31_s3, 2  ;;  %p164_p2 = scmp.lt.s32.totalorder %s892_s19, 3 }
   0x6   : > { %s1101_s3 = smov (%p33_p1, %s31_s3), 0  ;;  %p165_p3 = pnand %p795_p0, %p164_p2 }
   0x8   : > { %168 = sbr.rel (%p165_p3) target bundleno = 262 (0x106), region = 32 }
   0xd   : > { %p197_p4 = scmp.lt.s32.totalorder %s884_s17, 1  ;;  %v246_v2 = vlaneseq  ;;  %v894_v3 = vmov 0   ;;  %v423_v21 = vld [vmem:[%s1094_s1 + $0x10] sm:$0xff]  ;;  %v421_v22 = vld [vmem:[%s1094_s1] sm:$0xff]  ;;  %v895_v23 = vmov 0.0   ;;  %v424_v31 = vld [vmem:[%s1094_s1 + $0x18] sm:$0xff] }
   0xe   : > { %594 = vmatprep.mubr.bf16.mxu0 %v894_v3  ;;  %624 = vmatprep.mubr.bf16.mxu1 %v894_v3  ;;  %v422_v34 = vld [vmem:[%s1094_s1 + $0x8] sm:$0xff]  ;;  %v425_v36 = vld [vmem:[%s1094_s1 + $0x20] sm:$0xff]  ;;  %v428_v37 = vld [vmem:[%s1094_s1 + $0x38] sm:$0xff]  ;;  %vm543_vm2 = vcmask 261120   ;;  %vm680_vm3 = vcmask 130048  }
   0xf   : > { %s1103_s17 = smov (!%p197_p4, %s884_s17), 1  ;;  %v247_v4 = vand.u32 127, %v246_v2  ;;  %v357_v5 = vshrl.u32 %v246_v2, 7  ;;  %857 = vset.pattern.permute.xlu1 %v894_v3  ;;  %856 = vset.pattern.permute.xlu0 %v894_v3  ;;  %v426_v35 = vld [vmem:[%s1094_s1 + $0x28] sm:$0xff]  ;;  %v427_v41 = vld [vmem:[%s1094_s1 + $0x30] sm:$0xff]  ;;  %v864_v44 = vld [vmem:[%s1093_s0] sm:$0xff]  }
  0x10   : > { %s824_s20 = sshll.u32 %s1103_s17, 5  ;;  %445 = vperm.xlu1 %857, %v423_v21   ;;  %435 = vperm.xlu0 %856, %v421_v22   ;;  %v430_v42 = vld [vmem:[%s1094_s1 + $0x48] sm:$0xff]  ;;  %v865_v45 = vld [vmem:[%s1093_s0 + $0x18] sm:$0xff]   ;;  %v429_v46 = vld [vmem:[%s1094_s1 + $0x40] sm:$0xff]  ;;  %s829_s11 = smul.u32 192, %s1103_s17 }
  0x11   : > { %v249_v6 = vadd.s32 128, %v247_v4  ;;  %v358_v7 = vadd.s32 24, %v357_v5  ;;  %s204_s23 = scalar_lea.vmem %s1095_s2, %s824_s20  ;;  %v432_v47 = vld [vmem:[%s1094_s1 + $0x58] sm:$0xff]  ;;  %v431_v48 = vld [vmem:[%s1094_s1 + $0x50] sm:$0xff]  ;;  %v866_v49 = vld [vmem:[%s1093_s0 + $0x8] sm:$0xff]  }
  0x12   : > { %v802_v8 = vld [vmem:[%s204_s23 + $0x10] sm:$0xf]  ;;  %v803_v9 = vld [vmem:[%s204_s23 + $0x14] sm:$0xff]   ;;  %v805_v12 = vld [vmem:[%s204_s23 + $0x4] ss:$24 sps:$4 sm:$0xff]   ;;  %s1040_s14 = scalar_lea.vmem %s1097_s4, %s829_s11 }
  0x13   : > { %vm250_vm0 = vcmp.lt.s32.totalorder %v249_v6, 144  ;;  %vm359_vm1 = vcmp.lt.s32.totalorder %v358_v7, 25  ;;  %320 = vst [vmem:[#allocation7 + $0x10] sm:$0xf] %v802_v8  ;;  %v323_v10 = vunpack.c.l.bf16 %v803_v9  ;;  %v354_v11 = vunpack.c.h.bf16 %v803_v9  ;;  %v216_v13 = vld [vmem:[%s204_s23] sm:$0xf] }
  0x14   : > { %v800_v14 = vld [vmem:[%s204_s23 + $0x8] sm:$0xf]  ;;  %v384_v15 = vunpack.c.h.bf16 %v805_v12  ;;  %234 = vst [vmem:[#allocation7] sm:$0xf] %v216_v13  ;;  %v237_v16 = vunpack.c.l.bf16 %v805_v12  ;;  %v801_v17 = vld [vmem:[%s204_s23 + $0xc] sm:$0xf]  ;;  %450 = vperm.xlu1 %857, %v424_v31   ;;  %440 = vperm.xlu0 %856, %v422_v34  }
  0x15   : > { %277 = vst [vmem:[#allocation7 + $0x8] sm:$0xf] %v800_v14  ;;  %v337_v18 = vsel %vm250_vm0, %v323_v10, %v924_v1  ;;  %v360_v19 = vsel %vm359_vm1, %v354_v11, %v924_v1  ;;  %v280_v20 = vunpack.c.l.bf16 %v801_v17  ;;  %v867_v50 = vld [vmem:[%s1093_s0 + $0x20] sm:$0xff]   ;;  %v868_v51 = vld [vmem:[%s1093_s0 + $0x10] sm:$0xff]   ;;  %v869_v52 = vld [vmem:[%s1093_s0 + $0x28] sm:$0xff]  }
  0x16   : > { %v339_v24 = vpack.c.bf16 %v895_v23, %v337_v18  ;;  %v369_v25 = vpack.c.bf16 %v895_v23, %v360_v19  ;;  %v390_v26 = vsel %vm359_vm1, %v384_v15, %v924_v1  ;;  %v251_v27 = vsel %vm250_vm0, %v237_v16, %v924_v1 }
  0x17   : > { %v398_v28 = vsel %vm250_vm0, %v390_v26, %v924_v1  ;;  %v253_v29 = vpack.c.bf16 %v895_v23, %v251_v27  ;;  %v294_v30 = vsel %vm250_vm0, %v280_v20, %v924_v1 }
  0x18   : > { %342 = vst [vmem:[#allocation7 + $0x14] sm:$0xf] %v339_v24  ;;  %372 = vst [vmem:[#allocation7 + $0x18] sm:$0xf] %v369_v25  ;;  %v400_v32 = vpack.c.bf16 %v895_v23, %v398_v28  ;;  %v296_v33 = vpack.c.bf16 %v895_v23, %v294_v30  ;;  %460 = vperm.xlu1 %857, %v426_v35   ;;  %455 = vperm.xlu0 %856, %v425_v36  }
  0x19   : > { %256 = vst [vmem:[#allocation7 + $0x4] sm:$0xf] %v253_v29 }
  0x1a   : > { %403 = vst [vmem:[#allocation7 + $0x1c] sm:$0xf] %v400_v32  ;;  %299 = vst [vmem:[#allocation7 + $0xc] sm:$0xf] %v296_v33 }
  0x1c   : > { %470 = vperm.xlu1 %857, %v428_v37   ;;  %v863_v43 = vld [vmem:[#allocation7] ss:$8 sps:$4 sm:$0xff]   ;;  %465 = vperm.xlu0 %856, %v427_v41  }
  0x1f   : > { %v860_v39 = vld [vmem:[#allocation7 + $0x10] ss:$8 sps:$4 sm:$0xff]  }
  0x20   : > { %480 = vperm.xlu1 %857, %v430_v42   ;;  %475 = vperm.xlu0 %856, %v429_v46  }
  0x21   : > { %v858_v38 = vld [vmem:[#allocation7 + $0x14] ss:$8 sps:$4 sm:$0xff]   ;;  %v861_v40 = vld [vmem:[#allocation7 + $0x4] ss:$8 sps:$4 sm:$0xff]  }
  0x22   : > { %574 = vmatprep.subr.bf16.mxu0 %v858_v38  ;;  %825 = vmatprep.subr.bf16.mxu1 %v858_v38 }
  0x23   : > { %575 = vmatpush1.bf16.msra.mxu0 %v860_v39  ;;  %827 = vmatpush1.bf16.msra.mxu1 %v860_v39 }
  0x24   : > { %576 = vmatprep.subr.bf16.mxu0 %v861_v40  ;;  %826 = vmatprep.subr.bf16.mxu1 %v861_v40 }
  0x25   : > { %490 = vperm.xlu1 %857, %v432_v47   ;;  %485 = vperm.xlu0 %856, %v431_v48  }
  0x27   : > { %577 = vmatpush1.bf16.msra.mxu0 %v863_v43  ;;  %828 = vmatpush1.bf16.msra.mxu1 %v863_v43 }
  0x2a   : > { %816 = vmatmul.mubr.msk.bf16.vlgmr.msra.gmra.mxu0 %vm543_vm2, %v864_v44  ;;  %819 = vmatmul.mubr.msk.bf16.vlgmr.msra.gmra.mxu1 %vm543_vm2, %v865_v45 }
  0x2b   : > { %604 = vmatprep.mubr.bf16.mxu0 %v894_v3  ;;  %634 = vmatprep.mubr.bf16.mxu1 %v894_v3 }
  0x32   : > { %817 = vmatmul.mubr.msk.bf16.gmra.mxu0 %vm543_vm2, %v866_v49  ;;  %820 = vmatmul.mubr.msk.bf16.gmra.mxu1 %vm543_vm2, %v867_v50 }
  0x33   : > { %614 = vmatprep.mubr.bf16.mxu0 %v894_v3  ;;  %644 = vmatprep.mubr.bf16.mxu1 %v894_v3 }
  0x3a   : > { %818 = vmatmul.mubr.msk.bf16.gmra.mxu0 %vm543_vm2, %v868_v51  ;;  %821 = vmatmul.mubr.msk.bf16.gmra.mxu1 %vm543_vm2, %v869_v52 }
  0x8b   : > { %v436_v53 = vpop.permute.xlu0 %435  ;;  %v446_v54 = vpop.permute.xlu1 %445 }
  0x8f   : > { %v441_v55 = vpop.permute.xlu0 %440  ;;  %v1030_v56 = vpop.permute.xlu1 %450 }
  0x93   : > { %v1032_v57 = vpop.permute.xlu0 %455  ;;  %v1034_v58 = vpop.permute.xlu1 %460 }
  0x97   : > { %v466_v59 = vpop.permute.xlu0 %465  ;;  %v471_v3 = vpop.permute.xlu1 %470 }
  0x9b   : > { %v476_v16 = vpop.permute.xlu0 %475  ;;  %v481_v29 = vpop.permute.xlu1 %480 }
  0xa0   : > { %v486_v42 = vpop.permute.xlu0 %485 }
  0xea   : > { %v596_v60 = vpop.f32.mrf.mxu0  ;;  %v626_v61 = vpop.f32.mrf.mxu1 }
  0xeb   : > { %v597_v62 = vadd.f32 %v596_v60, %v436_v53  ;;  %v627_v63 = vadd.f32 %v626_v61, %v466_v59 }
  0xec   : > { %v598_v0 = vpop.f32.mrf.mxu0  ;;  %v628_v2 = vpop.f32.mrf.mxu1 }
  0xed   : > { %v655_v4 = vmax.f32 %v597_v62, 0.0  ;;  %v667_v5 = vmax.f32 %v627_v63, 0.0  ;;  %v599_v6 = vadd.f32 %v598_v0, %v436_v53  ;;  %v629_v7 = vadd.f32 %v628_v2, %v466_v59 }
  0xee   : > { %v600_v8 = vpop.f32.mrf.mxu0  ;;  %v630_v9 = vpop.f32.mrf.mxu1 }
  0xef   : > { %679 = vst [vmem:[%s1040_s14] sm:$0xff] %v655_v4  ;;  %692 = vst [vmem:[%s1040_s14 + $0x60] sm:$0xff] %v667_v5  ;;  %v656_v10 = vmax.f32 %v599_v6, 0.0  ;;  %v668_v11 = vmax.f32 %v629_v7, 0.0  ;;  %v601_v12 = vadd.f32 %v600_v8, %v441_v55  ;;  %v631_v13 = vadd.f32 %v630_v9, %v471_v3 }
  0xf0   : > { %v602_v14 = vpop.f32.mrf.mxu0  ;;  %v632_v15 = vpop.f32.mrf.mxu1 }
  0xf1   : > { %681 = vst.msk [vmem:[%s1040_s14 + $0x8] sm:$0xff] %vm680_vm3, %v656_v10  ;;  %693 = vst.msk [vmem:[%s1040_s14 + $0x68] sm:$0xff] %vm680_vm3, %v668_v11  ;;  %v657_v17 = vmax.f32 %v601_v12, 0.0  ;;  %v669_v18 = vmax.f32 %v631_v13, 0.0  ;;  %v603_v19 = vadd.f32 %v602_v14, %v441_v55  ;;  %v633_v20 = vadd.f32 %v632_v15, %v471_v3  ;;  %v491_v55 = vpop.permute.xlu1 %490 }
  0xf2   : > { %v606_v21 = vpop.f32.mrf.mxu0  ;;  %v636_v22 = vpop.f32.mrf.mxu1 }
  0xf3   : > { %682 = vst [vmem:[%s1040_s14 + $0x10] sm:$0xff] %v657_v17  ;;  %694 = vst [vmem:[%s1040_s14 + $0x70] sm:$0xff] %v669_v18  ;;  %v658_v23 = vmax.f32 %v603_v19, 0.0  ;;  %v670_v24 = vmax.f32 %v633_v20, 0.0  ;;  %v607_v25 = vadd.f32 %v606_v21, %v446_v54  ;;  %v637_v26 = vadd.f32 %v636_v22, %v476_v16 }
  0xf4   : > { %v608_v27 = vpop.f32.mrf.mxu0  ;;  %v638_v28 = vpop.f32.mrf.mxu1 }
  0xf5   : > { %683 = vst.msk [vmem:[%s1040_s14 + $0x18] sm:$0xff] %vm680_vm3, %v658_v23  ;;  %695 = vst.msk [vmem:[%s1040_s14 + $0x78] sm:$0xff] %vm680_vm3, %v670_v24  ;;  %v659_v30 = vmax.f32 %v607_v25, 0.0  ;;  %v671_v31 = vmax.f32 %v637_v26, 0.0  ;;  %v609_v32 = vadd.f32 %v608_v27, %v446_v54  ;;  %v639_v33 = vadd.f32 %v638_v28, %v476_v16 }
  0xf6   : > { %v610_v34 = vpop.f32.mrf.mxu0  ;;  %v640_v35 = vpop.f32.mrf.mxu1 }
  0xf7   : > { %684 = vst [vmem:[%s1040_s14 + $0x20] sm:$0xff] %v659_v30  ;;  %696 = vst [vmem:[%s1040_s14 + $0x80] sm:$0xff] %v671_v31  ;;  %v660_v36 = vmax.f32 %v609_v32, 0.0  ;;  %v672_v37 = vmax.f32 %v639_v33, 0.0  ;;  %v611_v38 = vadd.f32 %v610_v34, %v1030_v56  ;;  %v641_v39 = vadd.f32 %v640_v35, %v481_v29 }
  0xf8   : > { %v612_v40 = vpop.f32.mrf.mxu0  ;;  %v642_v41 = vpop.f32.mrf.mxu1 }
  0xf9   : > { %685 = vst.msk [vmem:[%s1040_s14 + $0x28] sm:$0xff] %vm680_vm3, %v660_v36  ;;  %697 = vst.msk [vmem:[%s1040_s14 + $0x88] sm:$0xff] %vm680_vm3, %v672_v37  ;;  %v661_v43 = vmax.f32 %v611_v38, 0.0  ;;  %v673_v44 = vmax.f32 %v641_v39, 0.0  ;;  %v613_v45 = vadd.f32 %v612_v40, %v1030_v56  ;;  %v643_v46 = vadd.f32 %v642_v41, %v481_v29 }
  0xfa   : > { %v616_v47 = vpop.f32.mrf.mxu0  ;;  %v646_v48 = vpop.f32.mrf.mxu1 }
  0xfb   : > { %686 = vst [vmem:[%s1040_s14 + $0x30] sm:$0xff] %v661_v43  ;;  %698 = vst [vmem:[%s1040_s14 + $0x90] sm:$0xff] %v673_v44  ;;  %v662_v49 = vmax.f32 %v613_v45, 0.0  ;;  %v674_v50 = vmax.f32 %v643_v46, 0.0  ;;  %v617_v51 = vadd.f32 %v616_v47, %v1032_v57  ;;  %v647_v52 = vadd.f32 %v646_v48, %v486_v42 }
  0xfc   : > { %v618_v53 = vpop.f32.mrf.mxu0  ;;  %v648_v54 = vpop.f32.mrf.mxu1 }
  0xfd   : > { %687 = vst.msk [vmem:[%s1040_s14 + $0x38] sm:$0xff] %vm680_vm3, %v662_v49  ;;  %699 = vst.msk [vmem:[%s1040_s14 + $0x98] sm:$0xff] %vm680_vm3, %v674_v50  ;;  %v663_v56 = vmax.f32 %v617_v51, 0.0  ;;  %v675_v59 = vmax.f32 %v647_v52, 0.0  ;;  %v619_v60 = vadd.f32 %v618_v53, %v1032_v57  ;;  %v649_v61 = vadd.f32 %v648_v54, %v486_v42 }
  0xfe   : > { %v620_v62 = vpop.f32.mrf.mxu0  ;;  %v650_v63 = vpop.f32.mrf.mxu1 }
  0xff   : > { %688 = vst [vmem:[%s1040_s14 + $0x40] sm:$0xff] %v663_v56  ;;  %700 = vst [vmem:[%s1040_s14 + $0xa0] sm:$0xff] %v675_v59  ;;  %v664_v0 = vmax.f32 %v619_v60, 0.0  ;;  %v676_v2 = vmax.f32 %v649_v61, 0.0  ;;  %v621_v3 = vadd.f32 %v620_v62, %v1034_v58  ;;  %v651_v4 = vadd.f32 %v650_v63, %v491_v55 }
 0x100   : > { %v622_v5 = vpop.f32.mrf.mxu0  ;;  %v652_v6 = vpop.f32.mrf.mxu1 }
 0x101   : > { %689 = vst.msk [vmem:[%s1040_s14 + $0x48] sm:$0xff] %vm680_vm3, %v664_v0  ;;  %701 = vst.msk [vmem:[%s1040_s14 + $0xa8] sm:$0xff] %vm680_vm3, %v676_v2  ;;  %v665_v57 = vmax.f32 %v621_v3, 0.0  ;;  %v677_v7 = vmax.f32 %v651_v4, 0.0  ;;  %v623_v8 = vadd.f32 %v622_v5, %v1034_v58  ;;  %v653_v9 = vadd.f32 %v652_v6, %v491_v55 }
 0x103   : > { %690 = vst [vmem:[%s1040_s14 + $0x50] sm:$0xff] %v665_v57  ;;  %702 = vst [vmem:[%s1040_s14 + $0xb0] sm:$0xff] %v677_v7  ;;  %v666_v10 = vmax.f32 %v623_v8, 0.0  ;;  %v678_v11 = vmax.f32 %v653_v9, 0.0 }
 0x105   : > { %691 = vst.msk [vmem:[%s1040_s14 + $0x58] sm:$0xff] %vm680_vm3, %v666_v10  ;;  %703 = vst.msk [vmem:[%s1040_s14 + $0xb8] sm:$0xff] %vm680_vm3, %v678_v11 }
 0x106 PF: > { %s19_s19 = sadd.s32 1, %s892_s19   ;;  %s1098_s17 = smov %s888_s18 }
 0x107   : > { %p16_p5 = scmp.ge.s32.totalorder %s19_s19, 4   ;;  %s1099_s18 = smov %s1101_s3 }
 0x109   :  { %18 = sbr.rel (!%p16_p5) target bundleno = 3 (0x3), region = 76 }

</bundles_post_ra>
